<compile_context>
chip_gen: v7x
topology: tpu7x:2x2x1
jax: 0.10.0
libtpu: 0.0.40
codegen_flags: <defaults>
</compile_context>

<pallas_src>
import jax
import jax.numpy as jnp
from jax.experimental import pallas as pl
from jax.experimental.pallas import tpu as pltpu


_MAX_BLOCK_R = 2048  # 2048 rows * 128 lanes = 262,144 points per grid step


def _round_up(x, m):
    return -(-x // m) * m


def _pick_block_r(r):
    """Rows (of 128 points) per grid step.

    Aim for >= ~4 grid steps when the input is large (keeps the DMA pipeline
    busy and lets v7x shard the 'parallel' axis over both TensorCores) while
    capping the block for VMEM (3 MiB in / 1 MiB out per buffer at the cap).
    """
    target = _round_up(pl.cdiv(r, 4), 8)
    return max(8, min(_MAX_BLOCK_R, r, target))


def _box_sdf_kernel(params_ref, pts_ref, out_ref):
    # params_ref: SMEM (6,) f32 = [cx, cy, cz, hx, hy, hz]  (h = side_length / 2)
    # pts_ref:    VMEM (3, block_r, 128) f32 -- coordinate planes, point index
    #             is (sublane, lane) dense.
    # out_ref:    VMEM (block_r, 128) f32
    # Pure per-lane VPU math; no cross-sublane/lane reductions. sqrt -> EUP.
    px = pts_ref[0]
    py = pts_ref[1]
    pz = pts_ref[2]

    dx = jnp.abs(px - params_ref[0]) - params_ref[3]
    dy = jnp.abs(py - params_ref[1]) - params_ref[4]
    dz = jnp.abs(pz - params_ref[2]) - params_ref[5]

    qx = jnp.maximum(dx, 0.0)
    qy = jnp.maximum(dy, 0.0)
    qz = jnp.maximum(dz, 0.0)

    outside = jnp.sqrt(qx * qx + qy * qy + qz * qz)
    inside = jnp.minimum(jnp.maximum(jnp.maximum(dx, dy), dz), 0.0)
    out_ref[...] = outside + inside


@jax.jit
def box_sdf(points, center, side_lengths):
    """points: (..., 3) float32; center, side_lengths: (3,) or (1, 3).
    Returns signed distance of shape (N, 1), N = prod(points.shape[:-1])."""
    pts = points.reshape(-1, 3).astype(jnp.float32)
    n = pts.shape[0]

    # Pad point count to a multiple of 8*128 so points tile into full
    # (sublane, lane) vregs. Pad is <= 1023 points and only applied if needed;
    # it fuses with the transpose below.
    n_pad = _round_up(n, 8 * 128)
    if n_pad != n:
        pts = jnp.pad(pts, ((0, n_pad - n), (0, 0)))
    r = n_pad // 128

    # (N, 3) -> (3, R, 128): a single XLA transpose pass; point index becomes
    # lane-dense (last dim 128) and sublane-dense (rows), so the kernel is
    # pure dense VPU math on fully packed vregs.
    # TODO(synk): a fully fused path would read the interleaved (N, 3) layout
    # directly and deinterleave in-kernel (stride-3 lane work); only worth it
    # if this transpose shows up as a separate HBM pass in the trace.
    pts3 = pts.T.reshape(3, r, 128)

    block_r = _pick_block_r(r)
    grid = (pl.cdiv(r, block_r),)

    params = jnp.concatenate([
        jnp.asarray(center, jnp.float32).reshape(-1),
        jnp.asarray(side_lengths, jnp.float32).reshape(-1) * 0.5,
    ])  # (6,) = [cx, cy, cz, hx, hy, hz]

    out = pl.pallas_call(
        _box_sdf_kernel,
        out_shape=jax.ShapeDtypeStruct((r, 128), jnp.float32),
        grid_spec=pltpu.PrefetchScalarGridSpec(
            num_scalar_prefetch=0,
            grid=grid,
            in_specs=[
                pl.BlockSpec(memory_space=pltpu.MemorySpace.SMEM),     # params (6,)
                pl.BlockSpec((3, block_r, 128), lambda i: (0, i, 0)),  # points
            ],
            out_specs=pl.BlockSpec((block_r, 128), lambda i: (i, 0)),
        ),
        compiler_params=pltpu.CompilerParams(
            dimension_semantics=("parallel",)),
        cost_estimate=pl.CostEstimate(
            flops=21 * n_pad, transcendentals=n_pad, bytes_accessed=16 * n_pad),
    )(params, pts3)

    return out.reshape(-1)[:n, None]


def _box_sdf_ref(points, center, side_lengths):
    pts = points.reshape(-1, 3).astype(jnp.float32)
    c = jnp.asarray(center, jnp.float32).reshape(-1)
    s = jnp.asarray(side_lengths, jnp.float32).reshape(-1)
    diff = jnp.abs(pts - c[None, :]) - s[None, :] / 2.0
    outside = jnp.linalg.norm(jnp.maximum(diff, 0.0), axis=-1)
    inside = jnp.minimum(jnp.max(diff, axis=-1), 0.0)
    return (outside + inside)[:, None]


if __name__ == "__main__":
    key = jax.random.PRNGKey(0)
    # Deterministic "cfg" parameters (module stores them as (1, 3) params).
    center = jnp.array([[0.1, -0.2, 0.3]], dtype=jnp.float32)
    side_lengths = jnp.array([[1.0, 0.8, 1.2]], dtype=jnp.float32)

    k1, k2 = jax.random.split(key)
    # Case 1: aligned point count (8192) -> multi-step grid (4 steps).
    pts_a = jax.random.normal(k1, (2, 4096, 3), dtype=jnp.float32)
    # Case 2: ragged point count (999) -> exercises the padded-tail path.
    pts_b = jax.random.normal(k2, (3, 333, 3), dtype=jnp.float32)

    for pts in (pts_a, pts_b):
        sdf = box_sdf(pts, center, side_lengths)
        jax.block_until_ready(sdf)
        ref = _box_sdf_ref(pts, center, side_lengths)
        n = pts.reshape(-1, 3).shape[0]
        assert sdf.shape == (n, 1), sdf.shape
        err = float(jnp.max(jnp.abs(sdf - ref)))
        assert jnp.allclose(sdf, ref, atol=1e-5, rtol=1e-5), err

    print("KERNEL_OK")
</pallas_src>

<mosaic_0001>
module attributes {stable_mosaic.version = 11 : i64} {
  func.func @_box_sdf_kernel(%arg0: i32, %arg1: memref<6xf32, #tpu.memory_space<smem>>, %arg2: memref<3x16x128xf32, #tpu.memory_space<vmem>>, %arg3: memref<16x128xf32, #tpu.memory_space<vmem>>) attributes {dimension_semantics = [#tpu.dimension_semantics<parallel>], iteration_bounds = array<i64: 4>, scalar_prefetch = 0 : i64, scratch_operands = 0 : i64, tpu.core_type = #tpu.core_type<tc>, window_params = [{transform_indices = @transform_0, window_bounds = array<i64: 6>}, {transform_indices = @transform_1, window_bounds = array<i64: 3, 16, 128>}, {transform_indices = @transform_2, window_bounds = array<i64: 16, 128>}]} {
    %c0 = arith.constant 0 : index
    %c0_0 = arith.constant 0 : index
    %c0_1 = arith.constant 0 : index
    %0 = vector.load %arg2[%c0, %c0_0, %c0_1] : memref<3x16x128xf32, #tpu.memory_space<vmem>>, vector<1x16x128xf32>
    %1 = vector.shape_cast %0 : vector<1x16x128xf32> to vector<16x128xf32>
    %c1 = arith.constant 1 : index
    %c0_2 = arith.constant 0 : index
    %c0_3 = arith.constant 0 : index
    %2 = vector.load %arg2[%c1, %c0_2, %c0_3] : memref<3x16x128xf32, #tpu.memory_space<vmem>>, vector<1x16x128xf32>
    %3 = vector.shape_cast %2 : vector<1x16x128xf32> to vector<16x128xf32>
    %c2 = arith.constant 2 : index
    %c0_4 = arith.constant 0 : index
    %c0_5 = arith.constant 0 : index
    %4 = vector.load %arg2[%c2, %c0_4, %c0_5] : memref<3x16x128xf32, #tpu.memory_space<vmem>>, vector<1x16x128xf32>
    %5 = vector.shape_cast %4 : vector<1x16x128xf32> to vector<16x128xf32>
    %c0_6 = arith.constant 0 : index
    %6 = memref.load %arg1[%c0_6] : memref<6xf32, #tpu.memory_space<smem>>
    %7 = vector.broadcast %6 : f32 to vector<16x128xf32>
    %8 = arith.subf %1, %7 : vector<16x128xf32>
    %9 = math.absf %8 : vector<16x128xf32>
    %c3 = arith.constant 3 : index
    %10 = memref.load %arg1[%c3] : memref<6xf32, #tpu.memory_space<smem>>
    %11 = vector.broadcast %10 : f32 to vector<16x128xf32>
    %12 = arith.subf %9, %11 : vector<16x128xf32>
    %c1_7 = arith.constant 1 : index
    %13 = memref.load %arg1[%c1_7] : memref<6xf32, #tpu.memory_space<smem>>
    %14 = vector.broadcast %13 : f32 to vector<16x128xf32>
    %15 = arith.subf %3, %14 : vector<16x128xf32>
    %16 = math.absf %15 : vector<16x128xf32>
    %c4 = arith.constant 4 : index
    %17 = memref.load %arg1[%c4] : memref<6xf32, #tpu.memory_space<smem>>
    %18 = vector.broadcast %17 : f32 to vector<16x128xf32>
    %19 = arith.subf %16, %18 : vector<16x128xf32>
    %c2_8 = arith.constant 2 : index
    %20 = memref.load %arg1[%c2_8] : memref<6xf32, #tpu.memory_space<smem>>
    %21 = vector.broadcast %20 : f32 to vector<16x128xf32>
    %22 = arith.subf %5, %21 : vector<16x128xf32>
    %23 = math.absf %22 : vector<16x128xf32>
    %c5 = arith.constant 5 : index
    %24 = memref.load %arg1[%c5] : memref<6xf32, #tpu.memory_space<smem>>
    %25 = vector.broadcast %24 : f32 to vector<16x128xf32>
    %26 = arith.subf %23, %25 : vector<16x128xf32>
    %cst = arith.constant 0.000000e+00 : f32
    %27 = vector.broadcast %cst : f32 to vector<16x128xf32>
    %28 = arith.maximumf %12, %27 : vector<16x128xf32>
    %cst_9 = arith.constant 0.000000e+00 : f32
    %29 = vector.broadcast %cst_9 : f32 to vector<16x128xf32>
    %30 = arith.maximumf %19, %29 : vector<16x128xf32>
    %cst_10 = arith.constant 0.000000e+00 : f32
    %31 = vector.broadcast %cst_10 : f32 to vector<16x128xf32>
    %32 = arith.maximumf %26, %31 : vector<16x128xf32>
    %33 = arith.mulf %28, %28 : vector<16x128xf32>
    %34 = arith.mulf %30, %30 : vector<16x128xf32>
    %35 = arith.addf %33, %34 : vector<16x128xf32>
    %36 = arith.mulf %32, %32 : vector<16x128xf32>
    %37 = arith.addf %35, %36 : vector<16x128xf32>
    %38 = math.sqrt %37 : vector<16x128xf32>
    %39 = arith.maximumf %12, %19 : vector<16x128xf32>
    %40 = arith.maximumf %39, %26 : vector<16x128xf32>
    %cst_11 = arith.constant 0.000000e+00 : f32
    %41 = vector.broadcast %cst_11 : f32 to vector<16x128xf32>
    %42 = arith.minimumf %40, %41 : vector<16x128xf32>
    %43 = arith.addf %38, %42 : vector<16x128xf32>
    %c0_12 = arith.constant 0 : index
    %c0_13 = arith.constant 0 : index
    %44 = vector.load %arg3[%c0_12, %c0_13] : memref<16x128xf32, #tpu.memory_space<vmem>>, vector<16x128xf32>
    tpu.vector_store %arg3[%c0_12, %c0_13], %43 {strides = array<i32>} : memref<16x128xf32, #tpu.memory_space<vmem>>, vector<16x128xf32>,
    return
  }
  func.func @transform_0(%arg0: i32) -> i32 {
    %c0_i32 = arith.constant 0 : i32
    %c0_i32_0 = arith.constant 0 : i32
    return %c0_i32 : i32
  }
  func.func @transform_1(%arg0: i32) -> (i32, i32, i32) {
    %c0_i32 = arith.constant 0 : i32
    %c0_i32_0 = arith.constant 0 : i32
    %c0_i32_1 = arith.constant 0 : i32
    return %c0_i32, %arg0, %c0_i32_0 : i32, i32, i32
  }
  func.func @transform_2(%arg0: i32) -> (i32, i32) {
    %c0_i32 = arith.constant 0 : i32
    %c0_i32_0 = arith.constant 0 : i32
    return %arg0, %c0_i32 : i32, i32
  }
}

</mosaic_0001>

<bundles_post_ra>
// kernel: box_sdf.1
= control target key start
LH: loop header
LB: loop body
LE: loop exit
PB: predicated region body
PF: predicated region fallthrough
CT: control target
= control target key end

     0   :  { %7 = vsyncpa [#allocation4], 0  ;;  %s709_s0 = inlined_call_operand.vmem [shape: f32[6], index: 0, kind: input, shape index: {}]   ;;  %s710_s1 = inlined_call_operand.vmem [shape: f32[3,64,128], index: 1, kind: input, shape index: {}]   ;;  %s711_s2 = inlined_call_operand.hbm [shape: f32[64,128], index: 2, kind: output, shape index: {}]  }
   0x1   :  { %8 = vsyncpa [#allocation3], 0 }
   0x2   :  { %10 = vsyncpa [#allocation3 + $0x1], 0  ;;  %s570_s9 = smov 0   ;;  %s572_s10 = smov 0  }
   0x3   :  { %s574_s11 = smov 0   ;;  %s576_s12 = smov 0  }
   0x4 LB: > { %s591_s13 = sadd.s32 4294967295, %s549_s12   ;;  %s385_s14 = sadd.s32 4294967294, %s549_s12   ;;  %s549_s12 = sphi %s576_s12, %s722_s12   ;;  %s545_s11 = sphi %s574_s11, %s721_s11   ;;  %s541_s10 = sphi %s572_s10, %s720_s10   ;;  %s537_s9 = sphi %s570_s9, %s719_s9  }
   0x5   : > { %s595_s15 = sadd.s32 1, %s549_s12   ;;  %s44_s16 = sadd.s32 1, %s545_s11 }
   0x6   : > { %s41_s17 = ssub.s32 %s549_s12, %s595_s15  ;;  %p51_p0 = scmp.ne.s32.totalorder %s545_s11, %s541_s10 }
   0x7   : > { %p42_p1 = scmp.eq.s32.totalorder %s41_s17, 0  ;;  %p52_p2 = scmp.eq.s32.totalorder %s549_s12, 0 }
   0x8   : > { %p81_p3 = scmp.eq.s32.totalorder %s591_s13, 3  ;;  %p86_p4 = scmp.ne.s32.totalorder %s541_s10, %s537_s9 }
   0x9   : > { %s607_s18 = scalar_select %p42_p1, %s545_s11, %s44_s16  }
   0xa   : > { %p609_p5 = por %p52_p2, %p51_p0  ;;  %p613_p6 = por %p81_p3, %p51_p0 }
   0xb   : > { %p87_p7 = scmp.eq.s32.totalorder %s385_s14, 3  ;;  %p386_p8 = scmp.ge.s32.totalorder %s549_s12, 1 }
   0xc   : > { %s714_s20 = scalar_select %p613_p6, 1, 0 }
   0xd   : > { %p94_p9 = scmp.lt.s32.totalorder %s549_s12, 5  ;;  %p619_p10 = por %p87_p7, %p86_p4 }
   0xe   : > { %p426_p11 = scmp.eq.s32.totalorder %s591_s13, 0  ;;  %s107_s25 = sshll.u32 %s709_s0, 4  ;;  %s108_s25 = int_to_ptr.vmem [resolvable:$true] %s107_s25 }
   0xf   : > { %s715_s21 = scalar_select %p619_p10, 1, 0 }
  0x10   : > { %p624_p12 = pnand %p386_p8, %p94_p9  ;;  %s468_s26 = scalar_lea.vmem %s108_s25, 16 }
  0x11   : > { %p469_p1 = scmp.ne.s32.totalorder %s108_s25, %s468_s26  ;;  %p476_p7 = scmp.lt.s32.totalorder %s108_s25, %s108_s25 }
  0x12   : > { %p418_p13 = pneg %p624_p12  ;;  %p477_p8 = scmp.lt.s32.totalorder %s468_s26, %s468_s26 }
  0x14   : > { %p419_p0 = pnand %p426_p11, %p418_p13  ;;  %p478_p9 = por %p477_p8, %p476_p7 }
  0x16   : > { %p470_p2 = pneg %p419_p0 }
  0x18   : > { %p471_p3 = pnand %p470_p2, %p469_p1 }
  0x1a   : > { %p472_p4 = pneg %p471_p3 }
  0x1c   : > { %p479_p10 = pnand %p478_p9, %p472_p4 }
  0x1e   : > { %482 = shalt.err (!%p479_p10)
}
  0x1f   : > { %s551_s27 = smov [#allocation2]   ;;  %p388_p6 = scmp.ge.s32.totalorder %s549_s12, 4 }
  0x20   : > { %421 = dma.vmem_to_smem (!%p419_p0), %s108_s25, 16, %s551_s27, [#allocation4]  }
  0x21   : > { %114 = sbr.rel (%p388_p6) target bundleno = 47 (0x2f), region = 20 }
  0x28   : > { %117 = sbr.rel (!%p609_p5) target bundleno = 47 (0x2f), region = 24  ;;  %s119_s28 = sand.u32 (%p609_p5), 1, %s545_s11  }
  0x29   : > { %s408_s29 = sshll.u32 (%p609_p5), %s549_s12, 4  ;;  %s410_s30 = smul.u32 (%p609_p5), 48, %s119_s28 }
  0x2a   : > { %s124_s5 = scalar_lea.vmem (%p609_p5), %s710_s1, %s408_s29 }
  0x2b   : > { %v162_v0 = vld [vmem:[%s124_s5] sm:$0xff] (%p609_p5)  ;;  %v164_v1 = vld [vmem:[%s124_s5 + $0x8] sm:$0xff] (%p609_p5)  ;;  %s121_s6 = scalar_lea.vmem (%p609_p5), [#allocation5], %s410_s30 }
  0x2c   : > { %v166_v2 = vld [vmem:[%s124_s5 + $0x40] sm:$0xff] (%p609_p5)  ;;  %v168_v3 = vld [vmem:[%s124_s5 + $0x48] sm:$0xff] (%p609_p5)  ;;  %163 = vst [vmem:[%s121_s6] sm:$0xff] (%p609_p5), %v162_v0  ;;  %165 = vst [vmem:[%s121_s6 + $0x8] sm:$0xff] (%p609_p5), %v164_v1 }
  0x2d   : > { %v170_v4 = vld [vmem:[%s124_s5 + $0x80] sm:$0xff] (%p609_p5)  ;;  %v172_v5 = vld [vmem:[%s124_s5 + $0x88] sm:$0xff] (%p609_p5)  ;;  %167 = vst [vmem:[%s121_s6 + $0x10] sm:$0xff] (%p609_p5), %v166_v2  ;;  %169 = vst [vmem:[%s121_s6 + $0x18] sm:$0xff] (%p609_p5), %v168_v3 }
  0x2e   : > { %171 = vst [vmem:[%s121_s6 + $0x20] sm:$0xff] (%p609_p5), %v170_v4  ;;  %173 = vst [vmem:[%s121_s6 + $0x28] sm:$0xff] (%p609_p5), %v172_v5 }
  0x2f PF: > { %182 = sbr.rel (%p624_p12) target bundleno = 115 (0x73), region = 62 }
  0x36   : > { %528 = dma.done.wait (%p426_p11), [#allocation4], 16  }
  0x37   : > { %530 = vsyncadd (%p426_p11), [#allocation4], 4294967280  ;;  %s650_s7 = sand.u32 1, %s541_s10  }
  0x38   : > { %s411_s8 = smul.u32 48, %s650_s7 }
  0x3a   : > { %s191_s14 = scalar_lea.vmem [#allocation5], %s411_s8 }
  0x3b   : > { %195 = sfence }
  0x3c   : > { %s221_s16 = sld [smem:[#allocation2]]  ;;  %s398_s17 = sld [smem:[#allocation2 + $0x3]]  ;;  %v213_v6 = vld [vmem:[%s191_s14] sm:$0xff]  ;;  %v214_v7 = vld [vmem:[%s191_s14 + $0x8] sm:$0xff]  ;;  %v394_v8 = vld [vmem:[%s191_s14 + $0x10] sm:$0xff] }
  0x3d   : > { %s399_s19 = sld [smem:[#allocation2 + $0x1]]  ;;  %s653_s23 = sld [smem:[#allocation2 + $0x4]]  ;;  %v396_v10 = vld [vmem:[%s191_s14 + $0x20] sm:$0xff]  ;;  %v395_v12 = vld [vmem:[%s191_s14 + $0x18] sm:$0xff]  ;;  %v397_v13 = vld [vmem:[%s191_s14 + $0x28] sm:$0xff] }
  0x3e   : > { %s401_s22 = sld [smem:[#allocation2 + $0x2]]  ;;  %s655_s24 = sld [smem:[#allocation2 + $0x5]] }
  0x3f   : > { %s393_s25 = sshll.u32 %s650_s7, 4  ;;  %s409_s28 = sshll.u32 %s591_s13, 8 }
  0x40   : > { %s210_s26 = scalar_lea.vmem [#allocation6], %s393_s25  ;;  %s666_s3 = scalar_lea.hbm %s711_s2, %s409_s28 }
  0x41   : > { %s305_s27 = sshll.u32 %s210_s26, 4  ;;  %s292_s4 = scalar_lea.sflag [#allocation3], %s650_s7  ;;  %s661_s27 = int_to_ptr.vmem [resolvable:$true] %s305_s27 }
  0x42   : > { %v222_v9 = vstv %s221_s16  ;;  %v228_v15 = vstv %s398_s17  ;;  %s483_s13 = scalar_lea.vmem %s661_s27, 256  ;;  %p717_p6 = scmp.ne.s32.totalorder %s714_s20, 0 }
  0x43   : > { %v223_v11 = vsub.f32 %v213_v6, %v222_v9  ;;  %v224_v14 = vsub.f32 %v214_v7, %v222_v9  ;;  %v232_v16 = vstv %s399_s19  ;;  %v238_v19 = vstv %s653_s23  ;;  %p484_p5 = scmp.ne.s32.totalorder %s661_s27, %s483_s13  ;;  %s552_s5 = smov [#allocation6]  }
  0x44   : > { %v233_v18 = vsub.f32 %v394_v8, %v232_v16  ;;  %v242_v20 = vstv %s401_s22  ;;  %v234_v23 = vsub.f32 %v395_v12, %v232_v16  ;;  %v248_v27 = vstv %s655_s24  ;;  %s487_s6 = sshll.u32 %s552_s5, 4  ;;  %s488_s6 = int_to_ptr.vmem [resolvable:$false] %s487_s6 }
  0x45   : > { %v225_v17 = vand.u32 2147483647, %v223_v11  ;;  %v243_v21 = vsub.f32 %v396_v10, %v242_v20  ;;  %v226_v22 = vand.u32 2147483647, %v224_v14  ;;  %v244_v24 = vsub.f32 %v397_v13, %v242_v20  ;;  %p485_p10 = pnand %p484_p5, %p717_p6  ;;  %s489_s8 = scalar_lea.vmem %s488_s6, 512 }
  0x46   : > { %v235_v26 = vand.u32 2147483647, %v233_v18  ;;  %v236_v30 = vand.u32 2147483647, %v234_v23  ;;  %p490_p12 = scmp.lt.s32.totalorder %s661_s27, %s488_s6  ;;  %p491_p13 = scmp.lt.s32.totalorder %s489_s8, %s483_s13 }
  0x47   : > { %v229_v25 = vsub.f32 %v225_v17, %v228_v15  ;;  %v245_v28 = vand.u32 2147483647, %v243_v21  ;;  %v230_v29 = vsub.f32 %v226_v22, %v228_v15  ;;  %v246_v31 = vand.u32 2147483647, %v244_v24  ;;  %p486_p11 = pneg %p485_p10 }
  0x48   : > { %v239_v32 = vsub.f32 %v235_v26, %v238_v19  ;;  %v240_v35 = vsub.f32 %v236_v30, %v238_v19  ;;  %p492_p0 = por %p491_p13, %p490_p12 }
  0x49   : > { %v251_v33 = vmax.f32 %v229_v25, 0.0  ;;  %v249_v34 = vsub.f32 %v245_v28, %v248_v27  ;;  %v250_v36 = vsub.f32 %v246_v31, %v248_v27  ;;  %v252_v37 = vmax.f32 %v230_v29, 0.0 }
  0x4a   : > { %v253_v38 = vmax.f32 %v239_v32, 0.0  ;;  %v254_v41 = vmax.f32 %v240_v35, 0.0  ;;  %v281_v52 = vmax.f32 %v229_v25, %v239_v32  ;;  %v282_v53 = vmax.f32 %v230_v29, %v240_v35  ;;  %p493_p1 = pnand %p492_p0, %p486_p11 }
  0x4b   : > { %v257_v39 = vmul.f32 %v251_v33, %v251_v33  ;;  %v255_v40 = vmax.f32 %v249_v34, 0.0  ;;  %v256_v42 = vmax.f32 %v250_v36, 0.0  ;;  %v258_v43 = vmul.f32 %v252_v37, %v252_v37 }
  0x4c   : > { %v259_v44 = vmul.f32 %v253_v38, %v253_v38  ;;  %v260_v46 = vmul.f32 %v254_v41, %v254_v41  ;;  %v283_v54 = vmax.f32 %v281_v52, %v249_v34  ;;  %v284_v55 = vmax.f32 %v282_v53, %v250_v36 }
  0x4d   : > { %v263_v45 = vmul.f32 %v255_v40, %v255_v40  ;;  %v264_v47 = vmul.f32 %v256_v42, %v256_v42 }
  0x4e   : > { %v261_v48 = vadd.f32 %v259_v44, %v257_v39  ;;  %v262_v49 = vadd.f32 %v260_v46, %v258_v43  ;;  %v285_v58 = vmin.f32 %v283_v54, 0.0  ;;  %v286_v63 = vmin.f32 %v284_v55, 0.0 }
  0x50   : > { %v265_v50 = vadd.f32 %v263_v45, %v261_v48  ;;  %v266_v51 = vadd.f32 %v264_v47, %v262_v49 }
  0x52   : > { %464 = vrsqrt.f32 %v265_v50  ;;  %vm269_vm0 = vcmp.eq.f32.partialorder %v265_v50, inf  ;;  %v272_v57 = vand.u32 2147483648, %v265_v50  ;;  %vm271_vm1 = vcmp.eq.f32.partialorder %v265_v50, 0.0 }
  0x53   : > { %466 = vrsqrt.f32 %v266_v51  ;;  %vm276_vm2 = vcmp.eq.f32.partialorder %v266_v51, inf  ;;  %v279_v61 = vand.u32 2147483648, %v266_v51  ;;  %vm278_vm3 = vcmp.eq.f32.partialorder %v266_v51, 0.0 }
  0x5c   : > { %v465_v56 = vpop.eup %464 }
  0x5d   : > { %v467_v59 = vpop.eup %466  ;;  %v268_v60 = vmul.f32 %v465_v56, %v265_v50 }
  0x5e   : > { %v275_v62 = vmul.f32 %v467_v59, %v266_v51 }
  0x5f   : > { %v270_v0 = vsel %vm269_vm0, %v265_v50, %v268_v60 }
  0x60   : > { %v273_v1 = vsel %vm271_vm1, %v272_v57, %v270_v0  ;;  %v277_v2 = vsel %vm276_vm2, %v266_v51, %v275_v62 }
  0x61   : > { %v287_v3 = vadd.f32 %v285_v58, %v273_v1  ;;  %v280_v4 = vsel %vm278_vm3, %v279_v61, %v277_v2 }
  0x62   : > { %v288_v5 = vadd.f32 %v286_v63, %v280_v4 }
  0x63   : > { %289 = vst [vmem:[%s210_s26] sm:$0xff] %v287_v3 }
  0x64   : > { %290 = vst [vmem:[%s210_s26 + $0x8] sm:$0xff] %v288_v5 }
  0x65   : > { %496 = shalt.err (!%p493_p1)
}
  0x66   : > { %s497_s14 = scalar_lea.hbm %s666_s3, 256  ;;  %s501_s19 = scalar_lea.hbm %s711_s2, 1024 }
  0x67   : > { %p498_p2 = scmp.ne.s32.totalorder %s666_s3, %s497_s14  ;;  %p502_p7 = scmp.lt.u32.totalorder %s666_s3, %s711_s2 }
  0x68   : > { %p503_p8 = scmp.lt.u32.totalorder %s501_s19, %s497_s14  ;;  %p505_p5 = scmp.lt.u32.totalorder %s497_s14, %s666_s3 }
  0x69   : > { %p499_p3 = pnand %p498_p2, %p717_p6 }
  0x6a   : > { %p504_p9 = por %p503_p8, %p502_p7 }
  0x6b   : > { %p500_p4 = pneg %p499_p3 }
  0x6c   : > { %p506_p10 = por %p505_p5, %p504_p9 }
  0x6e   : > { %p507_p11 = pnand %p506_p10, %p500_p4 }
  0x70   : > { %510 = shalt.err (!%p507_p11)
}
  0x71   : > { %s553_s24 = smov 128   ;;  %s554_s25 = smov 8  }
  0x72   : > { %416 = dma.vmem_to_hbm [thread:$0]  (%p717_p6), %s661_s27, 256, %s666_s3, %s292_s4, %s553_s24, %s553_s24, %s554_s25  }
  0x73 PF: > { %p428_p12 = scmp.ge.s32.totalorder %s549_s12, 2  ;;  %s320_s26 = sand.u32 1, %s537_s9  }
  0x74   : > { %p718_p13 = scmp.ne.s32.totalorder %s715_s21, 0  ;;  %s321_s28 = scalar_lea.sflag [#allocation3], %s320_s26 }
  0x76   : > { %p423_p0 = pnand %p428_p12, %p718_p13 }
  0x78   : > { %532 = dma.done.wait (!%p423_p0), %s321_s28, 256  }
  0x79   : > { %534 = vsyncadd (!%p423_p0), %s321_s28, 4294967040  ;;  %p13_p1 = scmp.ge.s32.totalorder %s595_s15, 6   ;;  %s719_s9 = smov %s541_s10 }
  0x7a   : > { %s720_s10 = smov %s545_s11  ;;  %s721_s11 = smov %s607_s18 }
  0x7b   : > { %s722_s12 = smov %s595_s15  ;;  %15 = sbr.rel (!%p13_p1) target bundleno = 4 (0x4), region = 113 }
  0x82   :  { %326 = vsyncpa [#allocation3], 1 }
  0x83   :  { %328 = vsyncpa [#allocation3 + $0x1], 1 }
  0x84   :  { %329 = vsyncpa [#allocation4], 1 }
  0x85   :  { %331 = vsyncpa [#allocation4 + $0x1], 1 }

</bundles_post_ra>
